<compile_context>
chip_gen: v7x
topology: tpu7x:2x2x1
jax: 0.10.0
libtpu: 0.0.40
codegen_flags: <defaults>
</compile_context>

<pallas_src>
import functools

import jax
import jax.numpy as jnp
from jax import lax
from jax.experimental import pallas as pl
from jax.experimental.pallas import tpu as pltpu


# --------------------------- generation-aware budgets ------------------------ #
def _round_up(x, m):
    return (x + m - 1) // m * m


def _vmem_budget_bytes():
    """~75% of physical VMEM; conservative 48 MiB fallback if the query fails."""
    try:
        info = pltpu.get_tpu_info()
        cap = getattr(info, "vmem_capacity_bytes", None)
        if cap:
            return int(cap) * 3 // 4
    except Exception:
        pass
    return 48 * 1024 * 1024


_VMEM_BUDGET = _vmem_budget_bytes()
# v5e / v6e have 128 MiB VMEM (budget ~96 MiB); v7x has 64 MiB (budget ~48 MiB).
_BIG_VMEM = _VMEM_BUDGET >= (72 << 20)
_TM_TARGET = 1024 if _BIG_VMEM else 512     # projection row tile
_TS_TARGET = 512 if _BIG_VMEM else 256      # attention sequence tile


def _pick_channel_tile(dim, target):
    """Largest lane-friendly tile (multiple of 128, <= target) dividing dim."""
    for cand in (1024, 512, 256, 128):
        if cand <= target and cand <= dim and dim % cand == 0:
            return cand
    # TODO(synk): channel dims not divisible by 128 fall back to one full-dim
    # tile (fine for small E; OPT embed sizes all divide 256).
    return dim


# ------------------------- fused QKV projection kernel ---------------------- #
def _qkv_proj_kernel(x_ref, wq_ref, wk_ref, wv_ref, bq_ref, bk_ref, bv_ref,
                     q_ref, k_ref, v_ref, accq, acck, accv, *, q_scale):
    kk = pl.program_id(2)

    @pl.when(kk == 0)
    def _():
        accq[...] = jnp.zeros_like(accq)
        acck[...] = jnp.zeros_like(acck)
        accv[...] = jnp.zeros_like(accv)

    x = x_ref[...]                       # read the activation tile ONCE
    accq[...] += jnp.dot(x, wq_ref[...], preferred_element_type=jnp.float32)
    acck[...] += jnp.dot(x, wk_ref[...], preferred_element_type=jnp.float32)
    accv[...] += jnp.dot(x, wv_ref[...], preferred_element_type=jnp.float32)

    @pl.when(kk == pl.num_programs(2) - 1)
    def _():
        # Softmax scale folded into the q store: runs once per tile (free) instead
        # of once per (head, KV-block) inside the attention loop.
        q_ref[...] = ((accq[...] + bq_ref[...].astype(jnp.float32))
                      * jnp.float32(q_scale)).astype(q_ref.dtype)
        k_ref[...] = (acck[...] + bk_ref[...].astype(jnp.float32)).astype(k_ref.dtype)
        v_ref[...] = (accv[...] + bv_ref[...].astype(jnp.float32)).astype(v_ref.dtype)


def pallas_qkv_proj(x, wq, bq, wk, bk, wv, bv, q_scale):
    M, K = x.shape
    N = wq.shape[1]

    TM = _TM_TARGET if M >= _TM_TARGET else _round_up(M, 8)
    M_pad = _round_up(M, TM)
    if M_pad != M:                        # pad rows instead of a full-dim tile
        x = jnp.pad(x, ((0, M_pad - M), (0, 0)))
    TN = _pick_channel_tile(N, 256)
    TK = _pick_channel_tile(K, 512)
    grid = (M_pad // TM, N // TN, K // TK)

    x_spec = pl.BlockSpec((TM, TK), lambda i, j, kk: (i, kk))
    w_spec = pl.BlockSpec((TK, TN), lambda i, j, kk: (kk, j))
    b_spec = pl.BlockSpec((1, TN), lambda i, j, kk: (0, j))
    o_spec = pl.BlockSpec((TM, TN), lambda i, j, kk: (i, j))

    q, k, v = pl.pallas_call(
        functools.partial(_qkv_proj_kernel, q_scale=q_scale),
        out_shape=(jax.ShapeDtypeStruct((M_pad, N), x.dtype),) * 3,
        grid=grid,
        in_specs=[x_spec, w_spec, w_spec, w_spec, b_spec, b_spec, b_spec],
        out_specs=[o_spec, o_spec, o_spec],
        scratch_shapes=[pltpu.VMEM((TM, TN), jnp.float32) for _ in range(3)],
        compiler_params=pltpu.CompilerParams(
            dimension_semantics=("parallel", "parallel", "arbitrary"),
            vmem_limit_bytes=_VMEM_BUDGET),
    )(x, wq, wk, wv, bq.reshape(1, N), bk.reshape(1, N), bv.reshape(1, N))
    if M_pad != M:
        q, k, v = q[:M], k[:M], v[:M]
    return q, k, v


# ----------------------------- tiled linear (out_proj) ---------------------- #
def _linear_kernel(x_ref, w_ref, b_ref, o_ref, acc_ref):
    kk = pl.program_id(2)

    @pl.when(kk == 0)
    def _():
        acc_ref[...] = jnp.zeros_like(acc_ref)

    acc_ref[...] += jnp.dot(x_ref[...], w_ref[...], preferred_element_type=jnp.float32)

    @pl.when(kk == pl.num_programs(2) - 1)
    def _():
        o_ref[...] = (acc_ref[...] + b_ref[...].astype(jnp.float32)).astype(o_ref.dtype)


def pallas_linear(x, w, b):
    M, K = x.shape
    K2, N = w.shape
    assert K == K2

    TM = _TM_TARGET if M >= _TM_TARGET else _round_up(M, 8)
    M_pad = _round_up(M, TM)
    if M_pad != M:
        x = jnp.pad(x, ((0, M_pad - M), (0, 0)))
    TN = _pick_channel_tile(N, 256)
    TK = _pick_channel_tile(K, 512)
    grid = (M_pad // TM, N // TN, K // TK)

    out = pl.pallas_call(
        _linear_kernel,
        out_shape=jax.ShapeDtypeStruct((M_pad, N), x.dtype),
        grid=grid,
        in_specs=[
            pl.BlockSpec((TM, TK), lambda i, j, kk: (i, kk)),
            pl.BlockSpec((TK, TN), lambda i, j, kk: (kk, j)),
            pl.BlockSpec((1, TN), lambda i, j, kk: (0, j)),
        ],
        out_specs=pl.BlockSpec((TM, TN), lambda i, j, kk: (i, j)),
        scratch_shapes=[pltpu.VMEM((TM, TN), jnp.float32)],
        compiler_params=pltpu.CompilerParams(
            dimension_semantics=("parallel", "parallel", "arbitrary"),
            vmem_limit_bytes=_VMEM_BUDGET),
    )(x, w, b.reshape(1, N))
    if M_pad != M:
        out = out[:M]
    return out


# --------------------------- flash attention kernel -------------------------- #
def _flash_attn_kernel(q_ref, k_ref, v_ref, o_ref, m_sc, l_sc, acc_sc):
    # One (batch, head) per grid point; q_ref/k_ref/v_ref/o_ref are (TS, Dh).
    qi = pl.program_id(2)
    ki = pl.program_id(3)

    @pl.when(ki == 0)
    def _():
        m_sc[...] = jnp.full_like(m_sc, -1e30)
        l_sc[...] = jnp.zeros_like(l_sc)
        acc_sc[...] = jnp.zeros_like(acc_sc)

    def process(masked):
        # q is already pre-scaled by softmax_scale (folded into the projection).
        # NT-form dot_general: contract last dims, no explicit K transpose (XLU
        # stays free for the row-max / row-sum reductions).
        s = lax.dot_general(q_ref[...], k_ref[...],
                            dimension_numbers=(((1,), (1,)), ((), ())),
                            preferred_element_type=jnp.float32)      # (TS, TS)
        if masked:
            # Only the diagonal block pays for iota/compare/select, and only once.
            row = lax.broadcasted_iota(jnp.int32, s.shape, 0)
            col = lax.broadcasted_iota(jnp.int32, s.shape, 1)
            s = jnp.where(col <= row, s, jnp.float32(-1e30))
        m_prev = m_sc[...]
        m_new = jnp.maximum(m_prev, jnp.max(s, axis=-1, keepdims=True))
        alpha = jnp.exp(m_prev - m_new)
        p = jnp.exp(s - m_new)
        l_sc[...] = alpha * l_sc[...] + jnp.sum(p, axis=-1, keepdims=True)
        acc_sc[...] = alpha * acc_sc[...] + jnp.dot(
            p.astype(v_ref.dtype), v_ref[...], preferred_element_type=jnp.float32)
        m_sc[...] = m_new

    # Strictly-lower causal blocks: fully visible, no mask work.
    @pl.when(ki < qi)
    def _():
        process(masked=False)

    # Diagonal block: masked, and it is the last visible block -> finalize.
    # Blocks with ki > qi are fully masked and skipped entirely.
    @pl.when(ki == qi)
    def _():
        process(masked=True)
        # Exact divide: runs once per (b, h, qi) tile, off the critical path.
        o_ref[...] = (acc_sc[...] / l_sc[...]).astype(o_ref.dtype)


def pallas_flash_attention(q, k, v):
    """q, k, v: (B, H, T, Dh); q pre-scaled by softmax_scale. Causal attention."""
    B, H, T, Dh = q.shape
    TS = _TS_TARGET if T >= _TS_TARGET else _round_up(T, 8)
    T_pad = _round_up(T, TS)
    if T_pad != T:
        # Padding is safe under the causal mask (padded keys always have
        # col > row for real query rows; padded query rows are sliced off).
        pad = ((0, 0), (0, 0), (0, T_pad - T), (0, 0))
        q, k, v = jnp.pad(q, pad), jnp.pad(k, pad), jnp.pad(v, pad)
    n_blk = T_pad // TS
    grid = (B, H, n_blk, n_blk)

    q_map = lambda b, h, qi, ki: (b, h, qi, 0)
    # Clamp KV block index to the diagonal: fully-masked (skipped) steps reuse
    # the already-resident block, so no fresh DMA is issued for them.
    kv_map = lambda b, h, qi, ki: (b, h, jnp.minimum(ki, qi), 0)

    q_spec = pl.BlockSpec((None, None, TS, Dh), q_map)
    kv_spec = pl.BlockSpec((None, None, TS, Dh), kv_map)

    o = pl.pallas_call(
        _flash_attn_kernel,
        out_shape=jax.ShapeDtypeStruct((B, H, T_pad, Dh), q.dtype),
        grid=grid,
        in_specs=[q_spec, kv_spec, kv_spec],
        out_specs=q_spec,
        scratch_shapes=[
            pltpu.VMEM((TS, 1), jnp.float32),    # running max
            pltpu.VMEM((TS, 1), jnp.float32),    # running sum
            pltpu.VMEM((TS, Dh), jnp.float32),   # output accumulator
        ],
        # B and H lead as parallel axes -> balanced work across v7x's 2 TCs;
        # the KV axis is the (sequential) reduction axis.
        compiler_params=pltpu.CompilerParams(
            dimension_semantics=("parallel", "parallel", "parallel", "arbitrary"),
            vmem_limit_bytes=_VMEM_BUDGET),
    )(q, k, v)
    if T_pad != T:
        o = o[:, :, :T, :]
    return o


# ------------------------------- Module glue --------------------------------- #
def init_params(key, embed_dim, dtype=jnp.float32):
    ks = jax.random.split(key, 8)
    s = 0.02

    def lin(kw, kb):
        w = jax.random.normal(kw, (embed_dim, embed_dim), dtype) * s  # (in, out)
        b = jax.random.normal(kb, (embed_dim,), dtype) * s
        return w, b

    qw, qb = lin(ks[0], ks[1])
    kw, kb = lin(ks[2], ks[3])
    vw, vb = lin(ks[4], ks[5])
    ow, ob = lin(ks[6], ks[7])
    return dict(q_w=qw, q_b=qb, k_w=kw, k_b=kb, v_w=vw, v_b=vb, o_w=ow, o_b=ob)


def opt_flash_attention2_forward(hidden_states, params, num_heads):
    """OptFlashAttention2.forward (self-attn, attention_mask=None, eval mode).

    Returns attn_output of shape (B, T, E); attn_weights is None (flash path),
    past_key_value is None (is_decoder=False).
    """
    B, T, E = hidden_states.shape
    Dh = E // num_heads
    scale = float(Dh) ** -0.5  # flash_attn default softmax_scale (folded into q)

    x2d = hidden_states.reshape(B * T, E)
    q, k, v = pallas_qkv_proj(x2d, params["q_w"], params["q_b"],
                              params["k_w"], params["k_b"],
                              params["v_w"], params["v_b"], scale)

    # (B*T, E) -> (B, H, T, Dh): one XLA relayout pass per tensor; inside the
    # attention kernel every head block is then a full-extent (TS, Dh) tile:
    # no unaligned lane slices, no per-head Python unroll / vreg spills.
    def to_bhtd(x):
        return x.reshape(B, T, num_heads, Dh).transpose(0, 2, 1, 3)

    o = pallas_flash_attention(to_bhtd(q), to_bhtd(k), to_bhtd(v))   # (B,H,T,Dh)
    o = o.transpose(0, 2, 1, 3).reshape(B * T, E)
    out = pallas_linear(o, params["o_w"], params["o_b"])
    return out.reshape(B, T, E)


# ------------------------------ Pure-JAX ref ---------------------------------- #
def reference_forward(hidden_states, params, num_heads):
    B, T, E = hidden_states.shape
    Dh = E // num_heads
    scale = float(Dh) ** -0.5
    q = hidden_states @ params["q_w"] + params["q_b"]
    k = hidden_states @ params["k_w"] + params["k_b"]
    v = hidden_states @ params["v_w"] + params["v_b"]
    q = q.reshape(B, T, num_heads, Dh).transpose(0, 2, 1, 3)
    k = k.reshape(B, T, num_heads, Dh).transpose(0, 2, 1, 3)
    v = v.reshape(B, T, num_heads, Dh).transpose(0, 2, 1, 3)
    s = jnp.einsum("bhqd,bhkd->bhqk", q, k) * scale
    mask = jnp.tril(jnp.ones((T, T), bool))
    s = jnp.where(mask[None, None], s, -jnp.inf)
    p = jax.nn.softmax(s, axis=-1)
    o = jnp.einsum("bhqk,bhkd->bhqd", p, v)
    o = o.transpose(0, 2, 1, 3).reshape(B, T, E)
    return o @ params["o_w"] + params["o_b"]


if __name__ == "__main__":
    B, T, E, H = 2, 8, 32, 4  # head_dim = 8
    key = jax.random.PRNGKey(0)
    k_param, k_x = jax.random.split(key)
    params = init_params(k_param, E)
    hidden_states = jax.random.normal(k_x, (B, T, E), jnp.float32)

    out = opt_flash_attention2_forward(hidden_states, params, H)
    out = jax.block_until_ready(out)

    ref = reference_forward(hidden_states, params, H)
    assert out.shape == (B, T, E)
    assert jnp.allclose(out, ref, atol=1e-4, rtol=1e-4), "mismatch vs reference"
    print("KERNEL_OK")
</pallas_src>

<mosaic_0001>
module attributes {stable_mosaic.version = 11 : i64} {
  func.func @_qkv_proj_kernel(%arg0: i32, %arg1: i32, %arg2: i32, %arg3: memref<16x32xf32, #tpu.memory_space<vmem>>, %arg4: memref<32x32xf32, #tpu.memory_space<vmem>>, %arg5: memref<32x32xf32, #tpu.memory_space<vmem>>, %arg6: memref<32x32xf32, #tpu.memory_space<vmem>>, %arg7: memref<1x32xf32, #tpu.memory_space<vmem>>, %arg8: memref<1x32xf32, #tpu.memory_space<vmem>>, %arg9: memref<1x32xf32, #tpu.memory_space<vmem>>, %arg10: memref<16x32xf32, #tpu.memory_space<vmem>>, %arg11: memref<16x32xf32, #tpu.memory_space<vmem>>, %arg12: memref<16x32xf32, #tpu.memory_space<vmem>>, %arg13: memref<16x32xf32, #tpu.memory_space<vmem>>, %arg14: memref<16x32xf32, #tpu.memory_space<vmem>>, %arg15: memref<16x32xf32, #tpu.memory_space<vmem>>) attributes {dimension_semantics = [#tpu.dimension_semantics<parallel>, #tpu.dimension_semantics<parallel>, #tpu.dimension_semantics<arbitrary>], iteration_bounds = array<i64: 1, 1, 1>, scalar_prefetch = 0 : i64, scratch_operands = 3 : i64, tpu.core_type = #tpu.core_type<tc>, window_params = [{transform_indices = @transform_0, window_bounds = array<i64: 16, 32>}, {transform_indices = @transform_1, window_bounds = array<i64: 32, 32>}, {transform_indices = @transform_2, window_bounds = array<i64: 32, 32>}, {transform_indices = @transform_3, window_bounds = array<i64: 32, 32>}, {transform_indices = @transform_4, window_bounds = array<i64: 1, 32>}, {transform_indices = @transform_5, window_bounds = array<i64: 1, 32>}, {transform_indices = @transform_6, window_bounds = array<i64: 1, 32>}, {transform_indices = @transform_7, window_bounds = array<i64: 16, 32>}, {transform_indices = @transform_8, window_bounds = array<i64: 16, 32>}, {transform_indices = @transform_9, window_bounds = array<i64: 16, 32>}]} {
    %c0_i32 = arith.constant 0 : i32
    %0 = arith.cmpi eq, %arg2, %c0_i32 : i32
    %1 = arith.extui %0 : i1 to i32
    %c0_i32_0 = arith.constant 0 : i32
    %2 = arith.cmpi ne, %1, %c0_i32_0 : i32
    scf.if %2 {
      %cst_24 = arith.constant 0.000000e+00 : f32
      %22 = vector.broadcast %cst_24 : f32 to vector<16x32xf32>
      %c0_25 = arith.constant 0 : index
      %c0_26 = arith.constant 0 : index
      %23 = vector.load %arg13[%c0_25, %c0_26] : memref<16x32xf32, #tpu.memory_space<vmem>>, vector<16x32xf32>
      tpu.vector_store %arg13[%c0_25, %c0_26], %22 {strides = array<i32>} : memref<16x32xf32, #tpu.memory_space<vmem>>, vector<16x32xf32>,
      %cst_27 = arith.constant 0.000000e+00 : f32
      %24 = vector.broadcast %cst_27 : f32 to vector<16x32xf32>
      %c0_28 = arith.constant 0 : index
      %c0_29 = arith.constant 0 : index
      %25 = vector.load %arg14[%c0_28, %c0_29] : memref<16x32xf32, #tpu.memory_space<vmem>>, vector<16x32xf32>
      tpu.vector_store %arg14[%c0_28, %c0_29], %24 {strides = array<i32>} : memref<16x32xf32, #tpu.memory_space<vmem>>, vector<16x32xf32>,
      %cst_30 = arith.constant 0.000000e+00 : f32
      %26 = vector.broadcast %cst_30 : f32 to vector<16x32xf32>
      %c0_31 = arith.constant 0 : index
      %c0_32 = arith.constant 0 : index
      %27 = vector.load %arg15[%c0_31, %c0_32] : memref<16x32xf32, #tpu.memory_space<vmem>>, vector<16x32xf32>
      tpu.vector_store %arg15[%c0_31, %c0_32], %26 {strides = array<i32>} : memref<16x32xf32, #tpu.memory_space<vmem>>, vector<16x32xf32>,
    } else {
    }
    %c0 = arith.constant 0 : index
    %c0_1 = arith.constant 0 : index
    %3 = vector.load %arg3[%c0, %c0_1] : memref<16x32xf32, #tpu.memory_space<vmem>>, vector<16x32xf32>
    %c0_2 = arith.constant 0 : index
    %c0_3 = arith.constant 0 : index
    %4 = vector.load %arg13[%c0_2, %c0_3] : memref<16x32xf32, #tpu.memory_space<vmem>>, vector<16x32xf32>
    %c0_4 = arith.constant 0 : index
    %c0_5 = arith.constant 0 : index
    %5 = vector.load %arg4[%c0_4, %c0_5] : memref<32x32xf32, #tpu.memory_space<vmem>>, vector<32x32xf32>
    %cst = arith.constant dense<0.000000e+00> : vector<16x32xf32>
    %6 = tpu.matmul %3, %5, %cst {dimension_numbers = #tpu.dot_dimension_numbers<[1], [0], [0], [1], [0, 0, 1, 1], [], []>} : vector<16x32xf32>, vector<32x32xf32>, vector<16x32xf32> -> vector<16x32xf32>
    %7 = arith.addf %4, %6 : vector<16x32xf32>
    %c0_6 = arith.constant 0 : index
    %c0_7 = arith.constant 0 : index
    %8 = vector.load %arg13[%c0_6, %c0_7] : memref<16x32xf32, #tpu.memory_space<vmem>>, vector<16x32xf32>
    tpu.vector_store %arg13[%c0_6, %c0_7], %7 {strides = array<i32>} : memref<16x32xf32, #tpu.memory_space<vmem>>, vector<16x32xf32>,
    %c0_8 = arith.constant 0 : index
    %c0_9 = arith.constant 0 : index
    %9 = vector.load %arg14[%c0_8, %c0_9] : memref<16x32xf32, #tpu.memory_space<vmem>>, vector<16x32xf32>
    %c0_10 = arith.constant 0 : index
    %c0_11 = arith.constant 0 : index
    %10 = vector.load %arg5[%c0_10, %c0_11] : memref<32x32xf32, #tpu.memory_space<vmem>>, vector<32x32xf32>
    %cst_12 = arith.constant dense<0.000000e+00> : vector<16x32xf32>
    %11 = tpu.matmul %3, %10, %cst_12 {dimension_numbers = #tpu.dot_dimension_numbers<[1], [0], [0], [1], [0, 0, 1, 1], [], []>} : vector<16x32xf32>, vector<32x32xf32>, vector<16x32xf32> -> vector<16x32xf32>
    %12 = arith.addf %9, %11 : vector<16x32xf32>
    %c0_13 = arith.constant 0 : index
    %c0_14 = arith.constant 0 : index
    %13 = vector.load %arg14[%c0_13, %c0_14] : memref<16x32xf32, #tpu.memory_space<vmem>>, vector<16x32xf32>
    tpu.vector_store %arg14[%c0_13, %c0_14], %12 {strides = array<i32>} : memref<16x32xf32, #tpu.memory_space<vmem>>, vector<16x32xf32>,
    %c0_15 = arith.constant 0 : index
    %c0_16 = arith.constant 0 : index
    %14 = vector.load %arg15[%c0_15, %c0_16] : memref<16x32xf32, #tpu.memory_space<vmem>>, vector<16x32xf32>
    %c0_17 = arith.constant 0 : index
    %c0_18 = arith.constant 0 : index
    %15 = vector.load %arg6[%c0_17, %c0_18] : memref<32x32xf32, #tpu.memory_space<vmem>>, vector<32x32xf32>
    %cst_19 = arith.constant dense<0.000000e+00> : vector<16x32xf32>
    %16 = tpu.matmul %3, %15, %cst_19 {dimension_numbers = #tpu.dot_dimension_numbers<[1], [0], [0], [1], [0, 0, 1, 1], [], []>} : vector<16x32xf32>, vector<32x32xf32>, vector<16x32xf32> -> vector<16x32xf32>
    %17 = arith.addf %14, %16 : vector<16x32xf32>
    %c0_20 = arith.constant 0 : index
    %c0_21 = arith.constant 0 : index
    %18 = vector.load %arg15[%c0_20, %c0_21] : memref<16x32xf32, #tpu.memory_space<vmem>>, vector<16x32xf32>
    tpu.vector_store %arg15[%c0_20, %c0_21], %17 {strides = array<i32>} : memref<16x32xf32, #tpu.memory_space<vmem>>, vector<16x32xf32>,
    %c0_i32_22 = arith.constant 0 : i32
    %19 = arith.cmpi eq, %arg2, %c0_i32_22 : i32
    %20 = arith.extui %19 : i1 to i32
    %c0_i32_23 = arith.constant 0 : i32
    %21 = arith.cmpi ne, %20, %c0_i32_23 : i32
    scf.if %21 {
      %c0_24 = arith.constant 0 : index
      %c0_25 = arith.constant 0 : index
      %22 = vector.load %arg13[%c0_24, %c0_25] : memref<16x32xf32, #tpu.memory_space<vmem>>, vector<16x32xf32>
      %c0_26 = arith.constant 0 : index
      %c0_27 = arith.constant 0 : index
      %23 = vector.load %arg7[%c0_26, %c0_27] : memref<1x32xf32, #tpu.memory_space<vmem>>, vector<1x32xf32>
      %24 = vector.broadcast %23 : vector<1x32xf32> to vector<16x32xf32>
      %25 = arith.addf %22, %24 : vector<16x32xf32>
      %cst_28 = arith.constant 0.353553385 : f32
      %26 = vector.broadcast %cst_28 : f32 to vector<16x32xf32>
      %27 = arith.mulf %25, %26 : vector<16x32xf32>
      %c0_29 = arith.constant 0 : index
      %c0_30 = arith.constant 0 : index
      %28 = vector.load %arg10[%c0_29, %c0_30] : memref<16x32xf32, #tpu.memory_space<vmem>>, vector<16x32xf32>
      tpu.vector_store %arg10[%c0_29, %c0_30], %27 {strides = array<i32>} : memref<16x32xf32, #tpu.memory_space<vmem>>, vector<16x32xf32>,
      %c0_31 = arith.constant 0 : index
      %c0_32 = arith.constant 0 : index
      %29 = vector.load %arg14[%c0_31, %c0_32] : memref<16x32xf32, #tpu.memory_space<vmem>>, vector<16x32xf32>
      %c0_33 = arith.constant 0 : index
      %c0_34 = arith.constant 0 : index
      %30 = vector.load %arg8[%c0_33, %c0_34] : memref<1x32xf32, #tpu.memory_space<vmem>>, vector<1x32xf32>
      %31 = vector.broadcast %30 : vector<1x32xf32> to vector<16x32xf32>
      %32 = arith.addf %29, %31 : vector<16x32xf32>
      %c0_35 = arith.constant 0 : index
      %c0_36 = arith.constant 0 : index
      %33 = vector.load %arg11[%c0_35, %c0_36] : memref<16x32xf32, #tpu.memory_space<vmem>>, vector<16x32xf32>
      tpu.vector_store %arg11[%c0_35, %c0_36], %32 {strides = array<i32>} : memref<16x32xf32, #tpu.memory_space<vmem>>, vector<16x32xf32>,
      %c0_37 = arith.constant 0 : index
      %c0_38 = arith.constant 0 : index
      %34 = vector.load %arg15[%c0_37, %c0_38] : memref<16x32xf32, #tpu.memory_space<vmem>>, vector<16x32xf32>
      %c0_39 = arith.constant 0 : index
      %c0_40 = arith.constant 0 : index
      %35 = vector.load %arg9[%c0_39, %c0_40] : memref<1x32xf32, #tpu.memory_space<vmem>>, vector<1x32xf32>
      %36 = vector.broadcast %35 : vector<1x32xf32> to vector<16x32xf32>
      %37 = arith.addf %34, %36 : vector<16x32xf32>
      %c0_41 = arith.constant 0 : index
      %c0_42 = arith.constant 0 : index
      %38 = vector.load %arg12[%c0_41, %c0_42] : memref<16x32xf32, #tpu.memory_space<vmem>>, vector<16x32xf32>
      tpu.vector_store %arg12[%c0_41, %c0_42], %37 {strides = array<i32>} : memref<16x32xf32, #tpu.memory_space<vmem>>, vector<16x32xf32>,
    } else {
    }
    return
  }
  func.func @transform_0(%arg0: i32, %arg1: i32, %arg2: i32) -> (i32, i32) {
    %c0_i32 = arith.constant 0 : i32
    return %arg0, %arg2 : i32, i32
  }
  func.func @transform_1(%arg0: i32, %arg1: i32, %arg2: i32) -> (i32, i32) {
    %c0_i32 = arith.constant 0 : i32
    return %arg2, %arg1 : i32, i32
  }
  func.func @transform_2(%arg0: i32, %arg1: i32, %arg2: i32) -> (i32, i32) {
    %c0_i32 = arith.constant 0 : i32
    return %arg2, %arg1 : i32, i32
  }
  func.func @transform_3(%arg0: i32, %arg1: i32, %arg2: i32) -> (i32, i32) {
    %c0_i32 = arith.constant 0 : i32
    return %arg2, %arg1 : i32, i32
  }
  func.func @transform_4(%arg0: i32, %arg1: i32, %arg2: i32) -> (i32, i32) {
    %c0_i32 = arith.constant 0 : i32
    %c0_i32_0 = arith.constant 0 : i32
    return %c0_i32, %arg1 : i32, i32
  }
  func.func @transform_5(%arg0: i32, %arg1: i32, %arg2: i32) -> (i32, i32) {
    %c0_i32 = arith.constant 0 : i32
    %c0_i32_0 = arith.constant 0 : i32
    return %c0_i32, %arg1 : i32, i32
  }
  func.func @transform_6(%arg0: i32, %arg1: i32, %arg2: i32) -> (i32, i32) {
    %c0_i32 = arith.constant 0 : i32
    %c0_i32_0 = arith.constant 0 : i32
    return %c0_i32, %arg1 : i32, i32
  }
  func.func @transform_7(%arg0: i32, %arg1: i32, %arg2: i32) -> (i32, i32) {
    %c0_i32 = arith.constant 0 : i32
    return %arg0, %arg1 : i32, i32
  }
  func.func @transform_8(%arg0: i32, %arg1: i32, %arg2: i32) -> (i32, i32) {
    %c0_i32 = arith.constant 0 : i32
    return %arg0, %arg1 : i32, i32
  }
  func.func @transform_9(%arg0: i32, %arg1: i32, %arg2: i32) -> (i32, i32) {
    %c0_i32 = arith.constant 0 : i32
    return %arg0, %arg1 : i32, i32
  }
}

</mosaic_0001>

<bundles_post_ra>
// kernel: tpu_custom_call.1
= control target key start
LH: loop header
LB: loop body
LE: loop exit
PB: predicated region body
PF: predicated region fallthrough
CT: control target
= control target key end

     0   :  { %15 = vsyncpa [#allocation6], 0  ;;  %s935_s0 = inlined_call_operand.hbm [shape: f32[16,32], index: 0, kind: input, shape index: {}]   ;;  %s936_s1 = inlined_call_operand.hbm [shape: f32[32,32], index: 1, kind: input, shape index: {}]   ;;  %s937_s2 = inlined_call_operand.hbm [shape: f32[32,32], index: 2, kind: input, shape index: {}]   ;;  %s938_s3 = inlined_call_operand.hbm [shape: f32[32,32], index: 3, kind: input, shape index: {}]   ;;  %s939_s4 = inlined_call_operand.vmem [shape: f32[1,32], index: 4, kind: input, shape index: {}]   ;;  %s940_s5 = inlined_call_operand.vmem [shape: f32[1,32], index: 5, kind: input, shape index: {}]   ;;  %s941_s6 = inlined_call_operand.vmem [shape: f32[1,32], index: 6, kind: input, shape index: {}]   ;;  %s942_s7 = inlined_call_operand.hbm [shape: f32[16,32], index: 7, kind: output, shape index: {0}]   ;;  %s943_s8 = inlined_call_operand.hbm [shape: f32[16,32], index: 8, kind: output, shape index: {1}]   ;;  %s944_s9 = inlined_call_operand.hbm [shape: f32[16,32], index: 9, kind: output, shape index: {2}]  }
   0x1   :  { %16 = vsyncpa [#allocation9], 0 }
   0x2   :  { %17 = vsyncpa [#allocation12], 0 }
   0x3   :  { %18 = vsyncpa [#allocation7], 0 }
   0x4   :  { %19 = vsyncpa [#allocation15], 0  ;;  %s713_s30 = smov [#allocation8]   ;;  %s714_s11 = smov [#allocation5]  }
   0x5   :  { %s37_s10 = sshll.u32 %s713_s30, 4  ;;  %s25_s12 = sshll.u32 %s714_s11, 4  ;;  %s38_s10 = int_to_ptr.vmem [resolvable:$true] %s37_s10  ;;  %s773_s12 = int_to_ptr.vmem [resolvable:$true] %s25_s12 }
   0x6   :  { %s549_s15 = scalar_lea.hbm %s936_s1, 512 }
   0x7   :  { %p550_p0 = scmp.ne.s32.totalorder %s936_s1, %s549_s15  ;;  %p553_p1 = scmp.lt.u32.totalorder %s549_s15, %s936_s1 }
   0x9   :  { %p555_p2 = pnand %p553_p1, %p550_p0 }
   0xb   :  { %558 = shalt.err (!%p555_p2)
}
   0xc   :  { %s559_s20 = scalar_lea.vmem %s38_s10, 512  ;;  %p564_p4 = scmp.lt.s32.totalorder %s38_s10, %s38_s10 }
   0xd   :  { %p560_p3 = scmp.ne.s32.totalorder %s38_s10, %s559_s20  ;;  %p565_p5 = scmp.lt.s32.totalorder %s559_s20, %s559_s20 }
   0xf   :  { %p566_p6 = por %p565_p5, %p564_p4 }
  0x11   :  { %p567_p7 = pnand %p566_p6, %p560_p3 }
  0x13   :  { %570 = shalt.err (!%p567_p7)
}
  0x14   :  { %s715_s21 = smov 128   ;;  %s716_s22 = smov 8  }
  0x15   :  { %43 = dma.hbm_to_vmem [thread:$0]  %s936_s1, 512, %s38_s10, [#allocation9], %s715_s21, %s715_s21, %s716_s22  }
  0x16   :  { %s571_s27 = scalar_lea.hbm %s935_s0, 256 }
  0x17   :  { %p572_p8 = scmp.ne.s32.totalorder %s935_s0, %s571_s27  ;;  %p575_p9 = scmp.lt.u32.totalorder %s571_s27, %s935_s0 }
  0x19   :  { %p577_p10 = pnand %p575_p9, %p572_p8 }
  0x1b   :  { %580 = shalt.err (!%p577_p10)
}
  0x1c   :  { %s581_s13 = scalar_lea.vmem %s773_s12, 256  ;;  %p586_p12 = scmp.lt.s32.totalorder %s773_s12, %s773_s12 }
  0x1d   :  { %p582_p11 = scmp.ne.s32.totalorder %s773_s12, %s581_s13  ;;  %p587_p13 = scmp.lt.s32.totalorder %s581_s13, %s581_s13 }
  0x1f   :  { %p588_p0 = por %p587_p13, %p586_p12 }
  0x21   :  { %p589_p1 = pnand %p588_p0, %p582_p11 }
  0x23   :  { %592 = shalt.err (!%p589_p1)
}
  0x24   :  { %31 = dma.hbm_to_vmem [thread:$0]  %s935_s0, 256, %s773_s12, [#allocation6], %s715_s21, %s715_s21, %s716_s22  }
  0x25   :  { %s717_s14 = smov [#allocation10]   ;;  %s718_s16 = smov [#allocation11]  }
  0x26   :  { %s49_s15 = sshll.u32 %s717_s14, 4  ;;  %s61_s17 = sshll.u32 %s718_s16, 4  ;;  %s50_s15 = int_to_ptr.vmem [resolvable:$true] %s49_s15  ;;  %s810_s17 = int_to_ptr.vmem [resolvable:$true] %s61_s17 }
  0x27   :  { %s593_s20 = scalar_lea.hbm %s937_s2, 512 }
  0x28   :  { %p594_p2 = scmp.ne.s32.totalorder %s937_s2, %s593_s20  ;;  %p597_p3 = scmp.lt.u32.totalorder %s593_s20, %s937_s2 }
  0x2a   :  { %p599_p4 = pnand %p597_p3, %p594_p2 }
  0x2c   :  { %602 = shalt.err (!%p599_p4)
}
  0x2d   :  { %s603_s0 = scalar_lea.vmem %s50_s15, 512  ;;  %p608_p6 = scmp.lt.s32.totalorder %s50_s15, %s50_s15 }
  0x2e   :  { %p604_p5 = scmp.ne.s32.totalorder %s50_s15, %s603_s0  ;;  %p609_p7 = scmp.lt.s32.totalorder %s603_s0, %s603_s0 }
  0x30   :  { %p610_p8 = por %p609_p7, %p608_p6 }
  0x32   :  { %p611_p9 = pnand %p610_p8, %p604_p5 }
  0x34   :  { %614 = shalt.err (!%p611_p9)
}
  0x35   :  { %55 = dma.hbm_to_vmem [thread:$0]  %s937_s2, 512, %s50_s15, [#allocation9], %s715_s21, %s715_s21, %s716_s22  }
  0x36   :  { %s615_s30 = scalar_lea.hbm %s938_s3, 512 }
  0x37   :  { %p616_p10 = scmp.ne.s32.totalorder %s938_s3, %s615_s30  ;;  %p619_p11 = scmp.lt.u32.totalorder %s615_s30, %s938_s3 }
  0x39   :  { %p621_p12 = pnand %p619_p11, %p616_p10 }
  0x3b   :  { %624 = shalt.err (!%p621_p12)
}
  0x3c   :  { %s625_s14 = scalar_lea.vmem %s810_s17, 512  ;;  %p630_p0 = scmp.lt.s32.totalorder %s810_s17, %s810_s17 }
  0x3d   :  { %p626_p13 = scmp.ne.s32.totalorder %s810_s17, %s625_s14  ;;  %p631_p1 = scmp.lt.s32.totalorder %s625_s14, %s625_s14 }
  0x3f   :  { %p632_p2 = por %p631_p1, %p630_p0 }
  0x41   :  { %p633_p3 = pnand %p632_p2, %p626_p13 }
  0x43   :  { %636 = shalt.err (!%p633_p3)
}
  0x44   :  { %67 = dma.hbm_to_vmem [thread:$0]  %s938_s3, 512, %s810_s17, [#allocation12], %s715_s21, %s715_s21, %s716_s22  }
  0x45   :  { %703 = dma.done.wait [#allocation6], 256  }
  0x46   :  { %704 = vsyncadd [#allocation6], 4294967040 }
  0x47   :  { %705 = dma.done.wait [#allocation9], 1024  }
  0x48   :  { %706 = vsyncadd [#allocation9], 4294966272 }
  0x49   :  { %707 = dma.done.wait [#allocation12], 512  }
  0x4a   :  { %708 = vsyncadd [#allocation12], 4294966784  ;;  %vm90_vm0 = vcmask 261120   ;;  %v719_v0 = vmov 0.0   ;;  %v101_v1 = vld [vmem:[#allocation8] sm:$0xff]  ;;  %v102_v2 = vld [vmem:[#allocation8 + $0x8] sm:$0xff] }
  0x4b   :  { %92 = vst.msk [vmem:[#allocation2 + $0x8] sm:$0xff] %vm90_vm0, %v719_v0  ;;  %91 = vst.msk [vmem:[#allocation2] sm:$0xff] %vm90_vm0, %v719_v0  ;;  %v103_v3 = vld [vmem:[#allocation8 + $0x10] sm:$0xff]  ;;  %v515_v4 = vpack.c.bf16 %v102_v2, %v101_v1  ;;  %v104_v5 = vld [vmem:[#allocation8 + $0x18] sm:$0xff]  ;;  %s720_s19 = smov [#allocation14]   ;;  %s721_s23 = smov [#allocation13]  }
  0x4c   :  { %93 = vst.msk [vmem:[#allocation3] sm:$0xff] %vm90_vm0, %v719_v0  ;;  %94 = vst.msk [vmem:[#allocation3 + $0x8] sm:$0xff] %vm90_vm0, %v719_v0  ;;  %v193_v6 = vld [vmem:[#allocation10] sm:$0xff]  ;;  %v194_v7 = vld [vmem:[#allocation10 + $0x8] sm:$0xff]  ;;  %v519_v8 = vpack.c.bf16 %v104_v5, %v103_v3  ;;  %s422_s20 = sshll.u32 %s720_s19, 4  ;;  %s410_s24 = sshll.u32 %s721_s23, 4  ;;  %s423_s20 = int_to_ptr.vmem [resolvable:$true] %s422_s20  ;;  %s872_s24 = int_to_ptr.vmem [resolvable:$true] %s410_s24 }
  0x4d   :  { %95 = vst.msk [vmem:[#allocation4] sm:$0xff] %vm90_vm0, %v719_v0  ;;  %96 = vst.msk [vmem:[#allocation4 + $0x8] sm:$0xff] %vm90_vm0, %v719_v0  ;;  %v523_v9 = vpack.c.bf16 %v194_v7, %v193_v6  ;;  %v97_v10 = vld [vmem:[#allocation5] sm:$0xff]  ;;  %v278_v11 = vld [vmem:[#allocation11] sm:$0xff]  ;;  %516 = vmatprep.subr.bf16.mxu0 %v515_v4  ;;  %s722_s25 = smov [#allocation16]   ;;  %s637_s0 = scalar_lea.vmem %s423_s20, 256 }
  0x4e   :  { %490 = vmatprep.mubr.msk.f32.mxu0 %vm90_vm0, %v97_v10  ;;  %v279_v12 = vld [vmem:[#allocation11 + $0x8] sm:$0xff]  ;;  %v195_v13 = vld [vmem:[#allocation10 + $0x10] sm:$0xff]  ;;  %v196_v14 = vld [vmem:[#allocation10 + $0x18] sm:$0xff]  ;;  %518 = vmatpush3.bf16.msra.mxu0 %v515_v4  ;;  %s879_s26 = sshll.u32 %s722_s25, 4  ;;  %p638_p4 = scmp.ne.s32.totalorder %s423_s20, %s637_s0  ;;  %s435_s26 = int_to_ptr.vmem [resolvable:$true] %s879_s26 }
  0x4f   :  { %524 = vmatprep.subr.bf16.mxu1 %v523_v9  ;;  %v527_v15 = vpack.c.bf16 %v196_v14, %v195_v13  ;;  %520 = vmatprep.subr.bf16.mxu0 %v519_v8  ;;  %v531_v16 = vpack.c.bf16 %v279_v12, %v278_v11  ;;  %v280_v17 = vld [vmem:[#allocation11 + $0x10] sm:$0xff]  ;;  %v281_v18 = vld [vmem:[#allocation11 + $0x18] sm:$0xff]  ;;  %v461_v36 = vld [vmem:[%s939_s4] ss:$0 sm:$0xff]  ;;  %p642_p5 = scmp.lt.s32.totalorder %s423_s20, %s423_s20  ;;  %p643_p6 = scmp.lt.s32.totalorder %s637_s0, %s637_s0 }
  0x50   :  { %526 = vmatpush3.bf16.msra.mxu1 %v523_v9  ;;  %501 = vmatprep.mubr.msk.f32.mxu1 %vm90_vm0, %v97_v10  ;;  %v98_v19 = vld [vmem:[#allocation5 + $0x8] sm:$0xff]  ;;  %v535_v20 = vpack.c.bf16 %v281_v18, %v280_v17  ;;  %v462_v39 = vld [vmem:[%s940_s5] ss:$0 sm:$0xff] }
  0x51   :  { %528 = vmatprep.subr.bf16.mxu1 %v527_v15  ;;  %v463_v51 = vld [vmem:[%s941_s6] ss:$0 sm:$0xff]  ;;  %p644_p7 = por %p643_p6, %p642_p5 }
  0x52   :  { %522 = vmatpush3.bf16.msra.mxu0 %v519_v8  ;;  %v100_v21 = vld [vmem:[#allocation2 + $0x8] sm:$0xff]  ;;  %v99_v22 = vld [vmem:[#allocation2] sm:$0xff] }
  0x53   :  { %532 = vmatprep.subr.bf16.mxu0 %v531_v16  ;;  %v192_v23 = vld [vmem:[#allocation3 + $0x8] sm:$0xff]  ;;  %v191_v25 = vld [vmem:[#allocation3] sm:$0xff]  ;;  %p645_p8 = pnand %p644_p7, %p638_p4 }
  0x54   :  { %530 = vmatpush3.bf16.msra.mxu1 %v527_v15  ;;  %v277_v33 = vld [vmem:[#allocation4 + $0x8] sm:$0xff]  ;;  %v276_v34 = vld [vmem:[#allocation4] sm:$0xff] }
  0x55   :  { %491 = vmatmul.mubr.msk.f32.vlgmr.msra.gmra.mrb[0].mxu0 %vm90_vm0, %v98_v19 }
  0x56   :  { %534 = vmatpush3.bf16.msra.mxu0 %v531_v16  ;;  %512 = vmatprep.mubr.msk.f32.mxu0 %vm90_vm0, %v97_v10 }
  0x57   :  { %502 = vmatmul.mubr.msk.f32.vlgmr.msra.gmra.mrb[0].mxu1 %vm90_vm0, %v98_v19  ;;  %536 = vmatprep.subr.bf16.mxu0 %v535_v20 }
  0x5a   :  { %538 = vmatpush3.bf16.msra.mxu0 %v535_v20 }
  0x5d   :  { %513 = vmatmul.mubr.msk.f32.vlgmr.msra.gmra.mrb[2].mxu0 %vm90_vm0, %v98_v19 }
 0x128   :  { %v492_v24 = vpop.f32.mrb[0].mxu0 }
 0x129   :  { %v188_v26 = vadd.f32 %v492_v24, %v100_v21  ;;  %v178_v27 = vpop.f32.mrb[1].mxu0 }
 0x12a   :  { %v503_v28 = vpop.f32.mrb[0].mxu1  ;;  %v187_v29 = vadd.f32 %v178_v27, %v99_v22 }
 0x12b   :  { %v273_v30 = vadd.f32 %v503_v28, %v192_v23  ;;  %v263_v31 = vpop.f32.mrb[1].mxu1  ;;  %190 = vst.msk [vmem:[#allocation2 + $0x8] sm:$0xff] %vm90_vm0, %v188_v26 }
 0x12c   :  { %v272_v32 = vadd.f32 %v263_v31, %v191_v25  ;;  %189 = vst.msk [vmem:[#allocation2] sm:$0xff] %vm90_vm0, %v187_v29 }
 0x12d   :  { %275 = vst.msk [vmem:[#allocation3 + $0x8] sm:$0xff] %vm90_vm0, %v273_v30 }
 0x12e   :  { %274 = vst.msk [vmem:[#allocation3] sm:$0xff] %vm90_vm0, %v272_v32 }
 0x130   :  { %v514_v35 = vpop.f32.mrb[2].mxu0 }
 0x131   :  { %v358_v37 = vadd.f32 %v514_v35, %v277_v33  ;;  %v348_v38 = vpop.f32.mrb[3].mxu0 }
 0x132   :  { %v357_v40 = vadd.f32 %v348_v38, %v276_v34  ;;  %v365_v41 = vld [vmem:[#allocation2 + $0x8] sm:$0xff] }
 0x133   :  { %360 = vst.msk [vmem:[#allocation4 + $0x8] sm:$0xff] %vm90_vm0, %v358_v37  ;;  %v364_v43 = vld [vmem:[#allocation2] sm:$0xff]  ;;  %v374_v44 = vadd.f32 %v461_v36, %v365_v41 }
 0x134   :  { %v380_v42 = vld [vmem:[#allocation3 + $0x8] sm:$0xff]  ;;  %359 = vst.msk [vmem:[#allocation4] sm:$0xff] %vm90_vm0, %v357_v40  ;;  %v373_v47 = vadd.f32 %v461_v36, %v364_v43 }
 0x135   :  { %v379_v45 = vld [vmem:[#allocation3] sm:$0xff]  ;;  %v389_v46 = vadd.f32 %v462_v39, %v380_v42  ;;  %v376_v49 = vmul.f32 0.35355338, %v374_v44 }
 0x136   :  { %v388_v48 = vadd.f32 %v462_v39, %v379_v45  ;;  %v375_v50 = vmul.f32 0.35355338, %v373_v47 }
 0x137   :  { %391 = vst.msk [vmem:[#allocation14 + $0x8] sm:$0xff] %vm90_vm0, %v389_v46  ;;  %378 = vst.msk [vmem:[#allocation13 + $0x8] sm:$0xff] %vm90_vm0, %v376_v49 }
 0x138   :  { %390 = vst.msk [vmem:[#allocation14] sm:$0xff] %vm90_vm0, %v388_v48 }
 0x139   :  { %648 = shalt.err (!%p645_p8)
}
 0x13a   :  { %s649_s28 = scalar_lea.hbm %s943_s8, 256 }
 0x13b   :  { %p650_p9 = scmp.ne.s32.totalorder %s943_s8, %s649_s28  ;;  %p653_p10 = scmp.lt.u32.totalorder %s649_s28, %s943_s8 }
 0x13d   :  { %p655_p11 = pnand %p653_p10, %p650_p9 }
 0x13f   :  { %658 = shalt.err (!%p655_p11)
}
 0x140   :  { %428 = dma.vmem_to_hbm [thread:$0]  %s423_s20, 256, %s943_s8, [#allocation15], %s715_s21, %s715_s21, %s716_s22   ;;  %377 = vst.msk [vmem:[#allocation13] sm:$0xff] %vm90_vm0, %v375_v50 }
 0x141   :  { %s659_s10 = scalar_lea.vmem %s872_s24, 256  ;;  %p664_p13 = scmp.lt.s32.totalorder %s872_s24, %s872_s24 }
 0x142   :  { %p660_p12 = scmp.ne.s32.totalorder %s872_s24, %s659_s10  ;;  %p665_p0 = scmp.lt.s32.totalorder %s659_s10, %s659_s10 }
 0x144   :  { %p666_p1 = por %p665_p0, %p664_p13 }
 0x146   :  { %p667_p2 = pnand %p666_p1, %p660_p12 }
 0x148   :  { %670 = shalt.err (!%p667_p2)
}
 0x149   :  { %s671_s15 = scalar_lea.hbm %s942_s7, 256 }
 0x14a   :  { %p672_p3 = scmp.ne.s32.totalorder %s942_s7, %s671_s15  ;;  %p675_p4 = scmp.lt.u32.totalorder %s671_s15, %s942_s7 }
 0x14c   :  { %p677_p5 = pnand %p675_p4, %p672_p3 }
 0x14e   :  { %680 = shalt.err (!%p677_p5)
}
 0x14f   :  { %416 = dma.vmem_to_hbm [thread:$0]  %s872_s24, 256, %s942_s7, [#allocation7], %s715_s21, %s715_s21, %s716_s22   ;;  %v393_v52 = vld [vmem:[#allocation4 + $0x8] sm:$0xff]  ;;  %v392_v53 = vld [vmem:[#allocation4] sm:$0xff] }
 0x150   :  { %v402_v54 = vadd.f32 %v463_v51, %v393_v52  ;;  %v401_v55 = vadd.f32 %v463_v51, %v392_v53  ;;  %s681_s20 = scalar_lea.vmem %s435_s26, 256  ;;  %p686_p7 = scmp.lt.s32.totalorder %s435_s26, %s435_s26 }
 0x151   :  { %p682_p6 = scmp.ne.s32.totalorder %s435_s26, %s681_s20  ;;  %p687_p8 = scmp.lt.s32.totalorder %s681_s20, %s681_s20 }
 0x152   :  { %404 = vst.msk [vmem:[#allocation16 + $0x8] sm:$0xff] %vm90_vm0, %v402_v54  ;;  %403 = vst.msk [vmem:[#allocation16] sm:$0xff] %vm90_vm0, %v401_v55 }
 0x153   :  { %p688_p9 = por %p687_p8, %p686_p7 }
 0x155   :  { %p689_p10 = pnand %p688_p9, %p682_p6 }
 0x157   :  { %692 = shalt.err (!%p689_p10)
}
 0x158   :  { %s693_s7 = scalar_lea.hbm %s944_s9, 256 }
 0x159   :  { %p694_p11 = scmp.ne.s32.totalorder %s944_s9, %s693_s7  ;;  %p697_p12 = scmp.lt.u32.totalorder %s693_s7, %s944_s9 }
 0x15b   :  { %p699_p13 = pnand %p697_p12, %p694_p11 }
 0x15d   :  { %702 = shalt.err (!%p699_p13)
}
 0x15e   :  { %440 = dma.vmem_to_hbm [thread:$0]  %s435_s26, 256, %s944_s9, [#allocation15], %s715_s21, %s715_s21, %s716_s22  }
 0x15f   :  { %709 = dma.done.wait [#allocation7], 256  }
 0x160   :  { %710 = vsyncadd [#allocation7], 4294967040 }
 0x161   :  { %711 = dma.done.wait [#allocation15], 512  }
 0x162   :  { %712 = vsyncadd [#allocation15], 4294966784 }
 0x163   :  { %450 = vsyncpa [#allocation6], 1 }
 0x164   :  { %451 = vsyncpa [#allocation9], 1 }
 0x165   :  { %452 = vsyncpa [#allocation12], 1 }
 0x166   :  { %453 = vsyncpa [#allocation7], 1 }
 0x167   :  { %454 = vsyncpa [#allocation15], 1 }

</bundles_post_ra>
